<compile_context>
chip_gen: v7x
topology: tpu7x:2x2x1
jax: 0.10.0
libtpu: 0.0.40
codegen_flags: <defaults>
</compile_context>

<pallas_src>
import jax
import jax.numpy as jnp
from jax.experimental import pallas as pl
from jax.experimental.pallas import tpu as pltpu


# --------------------------------------------------------------------------- #
# Kernel
# --------------------------------------------------------------------------- #
def _threshold_kernel(tv_ref, x_ref, o_ref):
    x = x_ref[...]
    t = tv_ref[0].astype(x.dtype)   # SMEM scalar read (scalar slot, ~free)
    v = tv_ref[1].astype(x.dtype)
    # torch.where(x > threshold, x, value); NaN compares False -> value.
    o_ref[...] = jnp.where(x > t, x, v)


# --------------------------------------------------------------------------- #
# Tiling policy helpers
# --------------------------------------------------------------------------- #
def _round_down(a, m):
    return (a // m) * m


def _round_up(a, m):
    return -(-a // m) * m


def _sublane_multiple(dtype):
    # Sub-32-bit dtypes pack along sublanes: f32 -> 8, bf16/f16 -> 16, int8 -> 32.
    itemsize = jnp.dtype(dtype).itemsize
    return 8 * max(1, 4 // max(1, itemsize))


def _vmem_budget():
    """(target_block_bytes, vmem_limit_bytes), derived per TPU generation."""
    cap = None
    try:
        info = pltpu.get_tpu_info()
        cap = getattr(info, "vmem_capacity_bytes", None)
    except Exception:
        cap = None
    if cap is not None and cap <= 64 * 1024 * 1024:
        # v7x-class: 64 MiB physical VMEM per TensorCore. 4x (double-buffered
        # in+out) 8 MiB blocks = 32 MiB, well under a 48 MiB scoped limit.
        return 8 * 1024 * 1024, 48 * 1024 * 1024
    # v5e/v6e-class: 128 MiB physical VMEM. 4x 12 MiB = 48 MiB <= 64 MiB limit.
    return 12 * 1024 * 1024, 64 * 1024 * 1024


def _pick_lanes(total, shape):
    """Return (lane_width N, prefix length that is a multiple of N)."""
    last = shape[-1] if len(shape) >= 1 else 1
    if len(shape) >= 2 and last % 128 == 0 and 128 <= last <= 8192:
        # Native last dim is already lane-dense: collapse leading dims only.
        return last, total
    for n in (2048, 1024, 512, 256, 128):
        if total % n == 0:
            return n, total
    # Non-divisible flat size: run the divisible prefix through the kernel,
    # handle the short tail with a plain jnp.where (no pad + slice round trip).
    n = 512 if total >= 512 else 128
    return n, _round_down(total, n)


# --------------------------------------------------------------------------- #
# pallas_call wrapper on a 2D lane-dense view
# --------------------------------------------------------------------------- #
def _threshold_2d(x2d, tv, *, target_block_bytes, vmem_limit_bytes):
    M, N = x2d.shape
    itemsize = jnp.dtype(x2d.dtype).itemsize
    sub = _sublane_multiple(x2d.dtype)

    # Byte-targeted row tiling, rounded to the packed sublane multiple.
    rows = max(sub, target_block_bytes // max(1, N * itemsize))
    rows = max(sub, _round_down(rows, sub))
    tm = M if rows >= M else rows

    # Prefer >= 4 grid steps (>= 2 per TensorCore on v7x megacore) on large
    # inputs so BlockSpec pipelining can hide DMA on each core; >= 2 steps on
    # mid-sized inputs.
    total_bytes = M * N * itemsize
    if total_bytes > (2 << 20):
        cap = _round_up(-(-M // 4), sub)
        if sub <= cap < M:
            tm = min(tm, cap)
    elif total_bytes > (1 << 20):
        cap = _round_up(-(-M // 2), sub)
        if sub <= cap < M:
            tm = min(tm, cap)

    grid = (-(-M // tm),)

    return pl.pallas_call(
        _threshold_kernel,
        out_shape=jax.ShapeDtypeStruct((M, N), x2d.dtype),
        grid_spec=pl.GridSpec(
            grid=grid,
            in_specs=[
                pl.BlockSpec(memory_space=pltpu.MemorySpace.SMEM),  # (2,) scalars
                pl.BlockSpec((tm, N), lambda i: (i, 0)),
            ],
            out_specs=pl.BlockSpec((tm, N), lambda i: (i, 0)),
        ),
        compiler_params=pltpu.CompilerParams(
            dimension_semantics=("parallel",),
            vmem_limit_bytes=vmem_limit_bytes,
        ),
    )(tv, x2d)


# --------------------------------------------------------------------------- #
# Public API: CustomThreshold forward
# --------------------------------------------------------------------------- #
def custom_threshold(x, threshold=0.0, value=0.0):
    """Pallas TPU CustomThreshold over arbitrary-rank inputs."""
    orig_shape = x.shape
    dtype = x.dtype
    total = int(x.size)
    if total == 0:
        return x

    n_lanes, main = _pick_lanes(total, orig_shape)

    if main == 0:
        # Tiny (<128 elem) input: a fused jnp.where already runs at roofline.
        return jnp.where(x > jnp.asarray(threshold, dtype), x,
                         jnp.asarray(value, dtype))

    tv = jnp.array([threshold, value], dtype=jnp.float32)
    target_block_bytes, vmem_limit_bytes = _vmem_budget()

    flat = x.reshape(-1)
    main_out = _threshold_2d(
        flat[:main].reshape(-1, n_lanes), tv,
        target_block_bytes=target_block_bytes,
        vmem_limit_bytes=vmem_limit_bytes,
    ).reshape(-1)

    if main == total:
        return main_out.reshape(orig_shape)

    # Short non-divisible tail handled without padding the whole array.
    tail = flat[main:]
    tail_out = jnp.where(tail > jnp.asarray(threshold, dtype), tail,
                         jnp.asarray(value, dtype))
    return jnp.concatenate([main_out, tail_out]).reshape(orig_shape)


# --------------------------------------------------------------------------- #
# Demo / correctness check
# --------------------------------------------------------------------------- #
if __name__ == "__main__":
    key = jax.random.PRNGKey(0)

    # Small NCHW-style activation tensor: (2, 4, 16, 16).
    x = jax.random.normal(key, (2, 4, 16, 16), dtype=jnp.float32)
    threshold, value = 0.0, 0.0
    out = jax.block_until_ready(custom_threshold(x, threshold, value))
    ref = jnp.where(x > threshold, x, jnp.asarray(value, x.dtype))
    assert out.shape == x.shape and out.dtype == x.dtype
    assert jnp.allclose(out, ref), "mismatch vs reference (small)"

    # Mid-size, multi-grid-step case with a lane-dense native last dim.
    x_big = jax.random.normal(jax.random.PRNGKey(1), (4, 8, 128, 256), jnp.float32)
    out_big = jax.block_until_ready(custom_threshold(x_big, 0.25, -1.0))
    ref_big = jnp.where(x_big > 0.25, x_big, jnp.asarray(-1.0, x_big.dtype))
    assert jnp.allclose(out_big, ref_big), "mismatch vs reference (big)"

    # Non-divisible flat size -> prefix kernel + jnp.where tail path.
    x_odd = jax.random.normal(jax.random.PRNGKey(2), (5, 130), jnp.float32)
    out_odd = jax.block_until_ready(custom_threshold(x_odd, -0.5, 2.0))
    ref_odd = jnp.where(x_odd > -0.5, x_odd, jnp.asarray(2.0, x_odd.dtype))
    assert jnp.allclose(out_odd, ref_odd), "mismatch vs reference (odd)"

    print("KERNEL_OK")
</pallas_src>

<mosaic_0001>
module attributes {stable_mosaic.version = 11 : i64} {
  func.func @_threshold_kernel(%arg0: i32, %arg1: memref<2xf32, #tpu.memory_space<smem>>, %arg2: memref<1x2048xf32, #tpu.memory_space<vmem>>, %arg3: memref<1x2048xf32, #tpu.memory_space<vmem>>) attributes {dimension_semantics = [#tpu.dimension_semantics<parallel>], iteration_bounds = array<i64: 1>, scalar_prefetch = 0 : i64, scratch_operands = 0 : i64, tpu.core_type = #tpu.core_type<tc>, window_params = [{transform_indices = @transform_0, window_bounds = array<i64: 2>}, {transform_indices = @transform_1, window_bounds = array<i64: 1, 2048>}, {transform_indices = @transform_2, window_bounds = array<i64: 1, 2048>}]} {
    %c0 = arith.constant 0 : index
    %c0_0 = arith.constant 0 : index
    %0 = vector.load %arg2[%c0, %c0_0] : memref<1x2048xf32, #tpu.memory_space<vmem>>, vector<1x2048xf32>
    %c0_1 = arith.constant 0 : index
    %1 = memref.load %arg1[%c0_1] : memref<2xf32, #tpu.memory_space<smem>>
    %c1 = arith.constant 1 : index
    %2 = memref.load %arg1[%c1] : memref<2xf32, #tpu.memory_space<smem>>
    %3 = vector.broadcast %1 : f32 to vector<1x2048xf32>
    %4 = arith.cmpf ogt, %0, %3 : vector<1x2048xf32>
    %5 = vector.broadcast %2 : f32 to vector<1x2048xf32>
    %6 = arith.select %4, %0, %5 : vector<1x2048xi1>, vector<1x2048xf32>
    %c0_2 = arith.constant 0 : index
    %c0_3 = arith.constant 0 : index
    %7 = vector.load %arg3[%c0_2, %c0_3] : memref<1x2048xf32, #tpu.memory_space<vmem>>, vector<1x2048xf32>
    tpu.vector_store %arg3[%c0_2, %c0_3], %6 {strides = array<i32>} : memref<1x2048xf32, #tpu.memory_space<vmem>>, vector<1x2048xf32>,
    return
  }
  func.func @transform_0(%arg0: i32) -> i32 {
    %c0_i32 = arith.constant 0 : i32
    %c0_i32_0 = arith.constant 0 : i32
    return %c0_i32 : i32
  }
  func.func @transform_1(%arg0: i32) -> (i32, i32) {
    %c0_i32 = arith.constant 0 : i32
    %c0_i32_0 = arith.constant 0 : i32
    return %arg0, %c0_i32 : i32, i32
  }
  func.func @transform_2(%arg0: i32) -> (i32, i32) {
    %c0_i32 = arith.constant 0 : i32
    %c0_i32_0 = arith.constant 0 : i32
    return %arg0, %c0_i32 : i32, i32
  }
}

</mosaic_0001>

<bundles_post_ra>
// kernel: tpu_custom_call.1
= control target key start
LH: loop header
LB: loop body
LE: loop exit
PB: predicated region body
PF: predicated region fallthrough
CT: control target
= control target key end

     0   :  { %7 = vsyncpa [#allocation5], 0  ;;  %s181_s0 = inlined_call_operand.hbm [shape: f32[2], index: 0, kind: input, shape index: {}]   ;;  %s182_s1 = inlined_call_operand.hbm [shape: f32[1,2048], index: 1, kind: input, shape index: {}]   ;;  %s183_s2 = inlined_call_operand.hbm [shape: f32[1,2048], index: 2, kind: output, shape index: {}]  }
   0x1   :  { %8 = vsyncpa [#allocation3], 0 }
   0x2   :  { %9 = vsyncpa [#allocation4], 0  ;;  %s67_s11 = scalar_lea.hbm %s181_s0, 16 }
   0x3   :  { %p68_p0 = scmp.ne.s32.totalorder %s181_s0, %s67_s11  ;;  %p71_p1 = scmp.lt.u32.totalorder %s67_s11, %s181_s0 }
   0x5   :  { %p73_p2 = pnand %p71_p1, %p68_p0 }
   0x7   :  { %76 = shalt.err (!%p73_p2)
}
   0x8   :  { %s127_s16 = smov [#allocation2]   ;;  %s128_s19 = smov [#allocation6]  }
   0x9   :  { %17 = dma.hbm_to_smem %s181_s0, 16, %s127_s16, [#allocation5]  }
   0xa   :  { %s24_s20 = sshll.u32 %s128_s19, 4  ;;  %s77_s23 = scalar_lea.hbm %s182_s1, 256  ;;  %s25_s20 = int_to_ptr.vmem [resolvable:$true] %s24_s20 }
   0xb   :  { %p78_p3 = scmp.ne.s32.totalorder %s182_s1, %s77_s23  ;;  %p81_p4 = scmp.lt.u32.totalorder %s77_s23, %s182_s1 }
   0xd   :  { %p83_p5 = pnand %p81_p4, %p78_p3 }
   0xf   :  { %86 = shalt.err (!%p83_p5)
}
  0x10   :  { %s87_s28 = scalar_lea.vmem %s25_s20, 256  ;;  %p92_p7 = scmp.lt.s32.totalorder %s25_s20, %s25_s20 }
  0x11   :  { %p88_p6 = scmp.ne.s32.totalorder %s25_s20, %s87_s28  ;;  %p93_p8 = scmp.lt.s32.totalorder %s87_s28, %s87_s28 }
  0x13   :  { %p94_p9 = por %p93_p8, %p92_p7 }
  0x15   :  { %p95_p10 = pnand %p94_p9, %p88_p6 }
  0x17   :  { %98 = shalt.err (!%p95_p10)
}
  0x18   :  { %27 = dma.hbm_to_vmem [thread:$0]  %s182_s1, 256, %s25_s20, [#allocation3]  }
  0x19   :  { %121 = dma.done.wait [#allocation5], 16  }
  0x1a   :  { %122 = vsyncadd [#allocation5], 4294967280 }
  0x1b   :  { %123 = dma.done.wait [#allocation3], 256  }
  0x1c   :  { %124 = vsyncadd [#allocation3], 4294967040 }
  0x1d   :  { %34 = sfence }
  0x1e   :  { %s37_s30 = sld [smem:[#allocation2]]  ;;  %s63_s3 = sld [smem:[#allocation2 + $0x1]]  ;;  %v35_v0 = vld [vmem:[#allocation6] sm:$0xff]  ;;  %v36_v1 = vld [vmem:[#allocation6 + $0x8] sm:$0xff] }
  0x1f   :  { %s129_s4 = smov [#allocation7]  }
  0x20   :  { %s53_s5 = sshll.u32 %s129_s4, 4  ;;  %s54_s5 = int_to_ptr.vmem [resolvable:$true] %s53_s5 }
  0x21   :  { %s99_s1 = scalar_lea.vmem %s54_s5, 256  ;;  %p104_p12 = scmp.lt.s32.totalorder %s54_s5, %s54_s5 }
  0x22   :  { %p100_p11 = scmp.ne.s32.totalorder %s54_s5, %s99_s1  ;;  %p105_p13 = scmp.lt.s32.totalorder %s99_s1, %s99_s1 }
  0x24   :  { %v39_v2 = vstv %s37_s30  ;;  %v42_v3 = vstv %s63_s3  ;;  %p106_p0 = por %p105_p13, %p104_p12 }
  0x25   :  { %vm40_vm0 = vcmp.gt.f32.partialorder %v35_v0, %v39_v2  ;;  %vm41_vm1 = vcmp.gt.f32.partialorder %v36_v1, %v39_v2 }
  0x26   :  { %v43_v4 = vsel %vm40_vm0, %v35_v0, %v42_v3  ;;  %v44_v5 = vsel %vm41_vm1, %v36_v1, %v42_v3  ;;  %p107_p1 = pnand %p106_p0, %p100_p11 }
  0x27   :  { %45 = vst [vmem:[#allocation7] sm:$0xff] %v43_v4  ;;  %46 = vst [vmem:[#allocation7 + $0x8] sm:$0xff] %v44_v5 }
  0x28   :  { %110 = shalt.err (!%p107_p1)
}
  0x29   :  { %s111_s8 = scalar_lea.hbm %s183_s2, 256 }
  0x2a   :  { %p112_p2 = scmp.ne.s32.totalorder %s183_s2, %s111_s8  ;;  %p115_p3 = scmp.lt.u32.totalorder %s111_s8, %s183_s2 }
  0x2c   :  { %p117_p4 = pnand %p115_p3, %p112_p2 }
  0x2e   :  { %120 = shalt.err (!%p117_p4)
}
  0x2f   :  { %56 = dma.vmem_to_hbm [thread:$0]  %s54_s5, 256, %s183_s2, [#allocation4]  }
  0x30   :  { %125 = dma.done.wait [#allocation4], 256  }
  0x31   :  { %126 = vsyncadd [#allocation4], 4294967040 }
  0x32   :  { %60 = vsyncpa [#allocation3], 1 }
  0x33   :  { %61 = vsyncpa [#allocation4], 1 }
  0x34   :  { %62 = vsyncpa [#allocation5], 1 }

</bundles_post_ra>
